<compile_context>
chip_gen: v6e
topology: v6e:2x2x1
jax: 0.10.0
libtpu: 0.0.40
codegen_flags: <defaults>
</compile_context>

<pallas_src>
import math
import functools

import jax
import jax.numpy as jnp
from jax.experimental import pallas as pl
from jax.experimental.pallas import tpu as pltpu


# ----------------------------------------------------------------------------
# Kernel
# ----------------------------------------------------------------------------
def _mlp_kernel(x_ref,
                w1_ref, b1_ref,
                w2_ref, b2_ref,
                w3_ref, b3_ref,
                w4_ref, b4_ref,
                o_ref,
                *, mm_dtype, reduce_out):
    # x arrives f32; cast to the matmul dtype in-kernel (free under MXU slack).
    x = x_ref[...].astype(mm_dtype)

    # fc1: MXU matmul (bf16 in, f32 accumulate); bias + relu in f32.
    h = jnp.dot(x, w1_ref[...], preferred_element_type=jnp.float32)
    h = jnp.maximum(h + b1_ref[...], 0.0)

    # fc2
    h = jnp.dot(h.astype(mm_dtype), w2_ref[...],
                preferred_element_type=jnp.float32)
    h = jnp.maximum(h + b2_ref[...], 0.0)

    # fc3
    h = jnp.dot(h.astype(mm_dtype), w3_ref[...],
                preferred_element_type=jnp.float32)
    h = jnp.maximum(h + b3_ref[...], 0.0)

    if reduce_out:
        # out_dim == 1 head: contract h (bm, hidden) against the f32 (1, hidden)
        # w4 row (A @ B^T style dot_general).  The result is (1, bm) — already
        # lane-dense, so the store is an unmasked full-lane write instead of a
        # (bm, 1) masked vst epilogue.  Kept in f32 for head accuracy.
        out = jax.lax.dot_general(w4_ref[...], h, (((1,), (1,)), ((), ())),
                                  preferred_element_type=jnp.float32)
        out = out + b4_ref[...]                     # (1,1) broadcasts over (1,bm)
        o_ref[...] = out[None].astype(o_ref.dtype)  # (1, 1, bm) block
    else:
        out = jnp.dot(h.astype(w4_ref.dtype), w4_ref[...],
                      preferred_element_type=jnp.float32) + b4_ref[...]
        o_ref[...] = out.astype(o_ref.dtype)


# ----------------------------------------------------------------------------
# Wrapper
# ----------------------------------------------------------------------------
def _pick_bm(B, *, cap=512, split_threshold=256):
    """Batch-tile heuristic.

    - Small batch (B <= split_threshold): one grid step covering the whole
      batch — best on single-TC v5e/v6e (each extra step is ~0.35us overhead).
    - Large batch: an even number of grid steps (each tile <= cap rows) so the
      "parallel" grid axis balances across both v7x TensorCores.
    """
    round8 = lambda n: -(-n // 8) * 8
    if B <= split_threshold:
        return round8(B)
    steps = max(2, -(-B // cap))
    if steps % 2:
        steps += 1
    return round8(-(-B // steps))


def state_net_forward(x, prepared, *, bm=None):
    """x: (B, in_dim) float32.  prepared: output of prepare_state_net_params
    (weights already in their kernel dtypes; no per-call casts)."""
    B, in_dim = x.shape
    hidden = prepared["w1"].shape[1]
    out_dim = prepared["b4"].shape[-1]
    reduce_out = (out_dim == 1)
    mm_dtype = prepared["w1"].dtype

    if bm is None:
        bm = _pick_bm(B)
    bm = max(8, min(int(bm), 512))
    bm -= bm % 8
    bm = min(bm, -(-B // 8) * 8)

    nsteps = pl.cdiv(B, bm)
    grid = (nsteps,)

    full = lambda shape: pl.BlockSpec(shape, lambda i: (0, 0))
    in_specs = [
        pl.BlockSpec((bm, in_dim), lambda i: (i, 0)),        # x tile (f32)
        full((in_dim, hidden)), full((1, hidden)),            # fc1
        full((hidden, hidden)), full((1, hidden)),            # fc2
        full((hidden, hidden)), full((1, hidden)),            # fc3
        full(prepared["w4"].shape), full((1, out_dim)),       # fc4
    ]

    if reduce_out:
        # Lane-dense output slab: one (1, 1, bm) block per grid step.
        out_shape = jax.ShapeDtypeStruct((nsteps, 1, bm), x.dtype)
        out_specs = pl.BlockSpec((1, 1, bm), lambda i: (i, 0, 0))
    else:
        out_shape = jax.ShapeDtypeStruct((B, out_dim), x.dtype)
        out_specs = pl.BlockSpec((bm, out_dim), lambda i: (i, 0))

    kernel = functools.partial(_mlp_kernel, mm_dtype=mm_dtype,
                               reduce_out=reduce_out)

    out = pl.pallas_call(
        kernel,
        out_shape=out_shape,
        grid=grid,
        in_specs=in_specs,
        out_specs=out_specs,
        compiler_params=pltpu.CompilerParams(
            dimension_semantics=("parallel",)),
    )(x, prepared["w1"], prepared["b1"], prepared["w2"], prepared["b2"],
      prepared["w3"], prepared["b3"], prepared["w4"], prepared["b4"])

    if reduce_out:
        # (nsteps, 1, bm) -> flat row-major (layout-trivial) -> (B, 1).
        flat = out.reshape(nsteps * bm)
        if nsteps * bm != B:
            flat = flat[:B]
        out = flat.reshape(B, 1)
    return out


# ----------------------------------------------------------------------------
# Params: init (matches State_Net.init_weights) and one-time kernel prep
# ----------------------------------------------------------------------------
def init_state_net_params(key, in_dim, hidden_dim=128, out_dim=1):
    """Xavier-uniform with relu gain + bias 0.01, as in State_Net.init_weights()."""
    gain = math.sqrt(2.0)  # nn.init.calculate_gain('relu')

    def xavier(key, fan_in, fan_out):
        bound = gain * math.sqrt(6.0 / (fan_in + fan_out))
        # stored as (fan_in, fan_out) so kernel computes x @ W (== x @ W.T torch)
        return jax.random.uniform(key, (fan_in, fan_out),
                                  minval=-bound, maxval=bound,
                                  dtype=jnp.float32)

    k1, k2, k3, k4 = jax.random.split(key, 4)
    return {
        "w1": xavier(k1, in_dim, hidden_dim),
        "b1": jnp.full((1, hidden_dim), 0.01, jnp.float32),
        "w2": xavier(k2, hidden_dim, hidden_dim),
        "b2": jnp.full((1, hidden_dim), 0.01, jnp.float32),
        "w3": xavier(k3, hidden_dim, hidden_dim),
        "b3": jnp.full((1, hidden_dim), 0.01, jnp.float32),
        "w4": xavier(k4, hidden_dim, out_dim),
        "b4": jnp.full((1, out_dim), 0.01, jnp.float32),
    }


def prepare_state_net_params(params, *, use_bf16=True):
    """One-time cast/reshape of f32 params to kernel-ready form.  Call once
    per weight update (e.g. per optimizer step), NOT per forward."""
    mm_dtype = jnp.bfloat16 if use_bf16 else jnp.float32
    hidden = params["w1"].shape[1]
    out_dim = params["w4"].shape[1]
    prepared = {
        "w1": params["w1"].astype(mm_dtype),
        "w2": params["w2"].astype(mm_dtype),
        "w3": params["w3"].astype(mm_dtype),
        "b1": params["b1"].astype(jnp.float32).reshape(1, hidden),
        "b2": params["b2"].astype(jnp.float32).reshape(1, hidden),
        "b3": params["b3"].astype(jnp.float32).reshape(1, hidden),
        "b4": params["b4"].astype(jnp.float32).reshape(1, out_dim),
    }
    if out_dim == 1:
        # f32 (1, hidden) row for the lane-dense NT head.
        prepared["w4"] = params["w4"].astype(jnp.float32).reshape(1, hidden)
    else:
        prepared["w4"] = params["w4"].astype(mm_dtype)
    return prepared


# ----------------------------------------------------------------------------
# References
# ----------------------------------------------------------------------------
def state_net_reference_f32(x, p):
    h = jax.nn.relu(x @ p["w1"] + p["b1"])
    h = jax.nn.relu(h @ p["w2"] + p["b2"])
    h = jax.nn.relu(h @ p["w3"] + p["b3"])
    return h @ p["w4"] + p["b4"]


def state_net_reference_mixed(x, p, mm_dtype=jnp.bfloat16):
    """Mirrors the kernel's dtype policy (bf16 fc1-3 matmuls, f32 accum/bias/
    relu, f32 head)."""
    def mm(a, w):
        return jnp.dot(a.astype(mm_dtype), w.astype(mm_dtype),
                       preferred_element_type=jnp.float32)
    h = jax.nn.relu(mm(x, p["w1"]) + p["b1"])
    h = jax.nn.relu(mm(h, p["w2"]) + p["b2"])
    h = jax.nn.relu(mm(h, p["w3"]) + p["b3"])
    w4_row = p["w4"].astype(jnp.float32).reshape(1, -1)
    return jnp.sum(h * w4_row, axis=-1, keepdims=True) + p["b4"]


# ----------------------------------------------------------------------------
# Smoke test
# ----------------------------------------------------------------------------
if __name__ == "__main__":
    IN_DIM, HIDDEN, OUT_DIM = 32, 128, 1

    key = jax.random.PRNGKey(0)
    kx1, kx2, kp = jax.random.split(key, 3)
    params = init_state_net_params(kp, IN_DIM, HIDDEN, OUT_DIM)
    prepared = prepare_state_net_params(params)   # one-time cast, outside forward

    # Case 1: ragged batch (not a multiple of the tile) -> single grid step,
    # Pallas masks the padded rows of the ragged block; no wrapper pad/slice
    # of x.
    B1 = 203
    x1 = jax.random.normal(kx1, (B1, IN_DIM), dtype=jnp.float32)
    out1 = jax.block_until_ready(state_net_forward(x1, prepared))
    assert out1.shape == (B1, OUT_DIM)

    # Case 2: larger batch -> 2 parallel grid steps (320 rows each), feeding
    # both TensorCores on v7x; still a single fused kernel per step.
    B2 = 640
    x2 = jax.random.normal(kx2, (B2, IN_DIM), dtype=jnp.float32)
    out2 = jax.block_until_ready(state_net_forward(x2, prepared))
    assert out2.shape == (B2, OUT_DIM)

    for x, out in ((x1, out1), (x2, out2)):
        # Tight check vs. a reference mirroring the kernel's mixed precision.
        ref_mixed = state_net_reference_mixed(x, params)
        assert jnp.allclose(out, ref_mixed, atol=2e-3, rtol=2e-3), \
            "mismatch vs mixed-precision reference"
        # Loose sanity check vs. the pure-f32 PyTorch-equivalent forward.
        ref_f32 = state_net_reference_f32(x, params)
        assert jnp.allclose(out, ref_f32, atol=1.5e-1, rtol=1.5e-1), \
            "mismatch vs f32 reference"

    print("KERNEL_OK")
</pallas_src>

<mosaic_0001>
module attributes {stable_mosaic.version = 11 : i64} {
  func.func @_mlp_kernel(%arg0: i32, %arg1: memref<208x32xf32, #tpu.memory_space<vmem>>, %arg2: memref<32x128xbf16, #tpu.memory_space<vmem>>, %arg3: memref<1x128xf32, #tpu.memory_space<vmem>>, %arg4: memref<128x128xbf16, #tpu.memory_space<vmem>>, %arg5: memref<1x128xf32, #tpu.memory_space<vmem>>, %arg6: memref<128x128xbf16, #tpu.memory_space<vmem>>, %arg7: memref<1x128xf32, #tpu.memory_space<vmem>>, %arg8: memref<1x128xf32, #tpu.memory_space<vmem>>, %arg9: memref<1x1xf32, #tpu.memory_space<vmem>>, %arg10: memref<1x1x208xf32, #tpu.memory_space<vmem>>) attributes {dimension_semantics = [#tpu.dimension_semantics<parallel>], iteration_bounds = array<i64: 1>, scalar_prefetch = 0 : i64, scratch_operands = 0 : i64, tpu.core_type = #tpu.core_type<tc>, window_params = [{transform_indices = @transform_0, window_bounds = array<i64: 208, 32>}, {pipeline_mode = #tpu.pipeline_mode<synchronous>, transform_indices = @transform_1, window_bounds = array<i64: 32, 128>}, {pipeline_mode = #tpu.pipeline_mode<synchronous>, transform_indices = @transform_2, window_bounds = array<i64: 1, 128>}, {pipeline_mode = #tpu.pipeline_mode<synchronous>, transform_indices = @transform_3, window_bounds = array<i64: 128, 128>}, {pipeline_mode = #tpu.pipeline_mode<synchronous>, transform_indices = @transform_4, window_bounds = array<i64: 1, 128>}, {pipeline_mode = #tpu.pipeline_mode<synchronous>, transform_indices = @transform_5, window_bounds = array<i64: 128, 128>}, {pipeline_mode = #tpu.pipeline_mode<synchronous>, transform_indices = @transform_6, window_bounds = array<i64: 1, 128>}, {pipeline_mode = #tpu.pipeline_mode<synchronous>, transform_indices = @transform_7, window_bounds = array<i64: 1, 128>}, {pipeline_mode = #tpu.pipeline_mode<synchronous>, transform_indices = @transform_8, window_bounds = array<i64: 1, 1>}, {transform_indices = @transform_9, window_bounds = array<i64: 1, 1, 208>}]} {
    %c0 = arith.constant 0 : index
    %c0_0 = arith.constant 0 : index
    %0 = vector.load %arg1[%c0, %c0_0] : memref<208x32xf32, #tpu.memory_space<vmem>>, vector<208x32xf32>
    %1 = arith.truncf %0 : vector<208x32xf32> to vector<208x32xbf16>
    %c0_1 = arith.constant 0 : index
    %c0_2 = arith.constant 0 : index
    %2 = vector.load %arg2[%c0_1, %c0_2] : memref<32x128xbf16, #tpu.memory_space<vmem>>, vector<32x128xbf16>
    %cst = arith.constant dense<0.000000e+00> : vector<208x128xf32>
    %3 = tpu.matmul %1, %2, %cst {dimension_numbers = #tpu.dot_dimension_numbers<[1], [0], [0], [1], [0, 0, 1, 1], [], []>} : vector<208x32xbf16>, vector<32x128xbf16>, vector<208x128xf32> -> vector<208x128xf32>
    %c0_3 = arith.constant 0 : index
    %c0_4 = arith.constant 0 : index
    %4 = vector.load %arg3[%c0_3, %c0_4] : memref<1x128xf32, #tpu.memory_space<vmem>>, vector<1x128xf32>
    %5 = vector.broadcast %4 : vector<1x128xf32> to vector<208x128xf32>
    %6 = arith.addf %3, %5 : vector<208x128xf32>
    %cst_5 = arith.constant 0.000000e+00 : f32
    %7 = vector.broadcast %cst_5 : f32 to vector<208x128xf32>
    %8 = arith.maximumf %6, %7 : vector<208x128xf32>
    %9 = arith.truncf %8 : vector<208x128xf32> to vector<208x128xbf16>
    %c0_6 = arith.constant 0 : index
    %c0_7 = arith.constant 0 : index
    %10 = vector.load %arg4[%c0_6, %c0_7] : memref<128x128xbf16, #tpu.memory_space<vmem>>, vector<128x128xbf16>
    %cst_8 = arith.constant dense<0.000000e+00> : vector<208x128xf32>
    %11 = tpu.matmul %9, %10, %cst_8 {dimension_numbers = #tpu.dot_dimension_numbers<[1], [0], [0], [1], [0, 0, 1, 1], [], []>} : vector<208x128xbf16>, vector<128x128xbf16>, vector<208x128xf32> -> vector<208x128xf32>
    %c0_9 = arith.constant 0 : index
    %c0_10 = arith.constant 0 : index
    %12 = vector.load %arg5[%c0_9, %c0_10] : memref<1x128xf32, #tpu.memory_space<vmem>>, vector<1x128xf32>
    %13 = vector.broadcast %12 : vector<1x128xf32> to vector<208x128xf32>
    %14 = arith.addf %11, %13 : vector<208x128xf32>
    %cst_11 = arith.constant 0.000000e+00 : f32
    %15 = vector.broadcast %cst_11 : f32 to vector<208x128xf32>
    %16 = arith.maximumf %14, %15 : vector<208x128xf32>
    %17 = arith.truncf %16 : vector<208x128xf32> to vector<208x128xbf16>
    %c0_12 = arith.constant 0 : index
    %c0_13 = arith.constant 0 : index
    %18 = vector.load %arg6[%c0_12, %c0_13] : memref<128x128xbf16, #tpu.memory_space<vmem>>, vector<128x128xbf16>
    %cst_14 = arith.constant dense<0.000000e+00> : vector<208x128xf32>
    %19 = tpu.matmul %17, %18, %cst_14 {dimension_numbers = #tpu.dot_dimension_numbers<[1], [0], [0], [1], [0, 0, 1, 1], [], []>} : vector<208x128xbf16>, vector<128x128xbf16>, vector<208x128xf32> -> vector<208x128xf32>
    %c0_15 = arith.constant 0 : index
    %c0_16 = arith.constant 0 : index
    %20 = vector.load %arg7[%c0_15, %c0_16] : memref<1x128xf32, #tpu.memory_space<vmem>>, vector<1x128xf32>
    %21 = vector.broadcast %20 : vector<1x128xf32> to vector<208x128xf32>
    %22 = arith.addf %19, %21 : vector<208x128xf32>
    %cst_17 = arith.constant 0.000000e+00 : f32
    %23 = vector.broadcast %cst_17 : f32 to vector<208x128xf32>
    %24 = arith.maximumf %22, %23 : vector<208x128xf32>
    %c0_18 = arith.constant 0 : index
    %c0_19 = arith.constant 0 : index
    %25 = vector.load %arg8[%c0_18, %c0_19] : memref<1x128xf32, #tpu.memory_space<vmem>>, vector<1x128xf32>
    %cst_20 = arith.constant dense<0.000000e+00> : vector<1x208xf32>
    %26 = tpu.matmul %25, %24, %cst_20 {dimension_numbers = #tpu.dot_dimension_numbers<[1], [1], [0], [0], [0, 0, 1, 0], [], []>} : vector<1x128xf32>, vector<208x128xf32>, vector<1x208xf32> -> vector<1x208xf32>
    %c0_21 = arith.constant 0 : index
    %c0_22 = arith.constant 0 : index
    %27 = vector.load %arg9[%c0_21, %c0_22] : memref<1x1xf32, #tpu.memory_space<vmem>>, vector<1x1xf32>
    %28 = vector.broadcast %27 : vector<1x1xf32> to vector<1x208xf32>
    %29 = arith.addf %26, %28 : vector<1x208xf32>
    %30 = vector.shape_cast %29 : vector<1x208xf32> to vector<1x1x208xf32>
    %c0_23 = arith.constant 0 : index
    %c0_24 = arith.constant 0 : index
    %c0_25 = arith.constant 0 : index
    %31 = vector.load %arg10[%c0_23, %c0_24, %c0_25] : memref<1x1x208xf32, #tpu.memory_space<vmem>>, vector<1x1x208xf32>
    tpu.vector_store %arg10[%c0_23, %c0_24, %c0_25], %30 {strides = array<i32>} : memref<1x1x208xf32, #tpu.memory_space<vmem>>, vector<1x1x208xf32>,
    return
  }
  func.func @transform_0(%arg0: i32) -> (i32, i32) {
    %c0_i32 = arith.constant 0 : i32
    %c0_i32_0 = arith.constant 0 : i32
    return %arg0, %c0_i32 : i32, i32
  }
  func.func @transform_1(%arg0: i32) -> (i32, i32) {
    %c0_i32 = arith.constant 0 : i32
    %c0_i32_0 = arith.constant 0 : i32
    %c0_i32_1 = arith.constant 0 : i32
    return %c0_i32, %c0_i32_0 : i32, i32
  }
  func.func @transform_2(%arg0: i32) -> (i32, i32) {
    %c0_i32 = arith.constant 0 : i32
    %c0_i32_0 = arith.constant 0 : i32
    %c0_i32_1 = arith.constant 0 : i32
    return %c0_i32, %c0_i32_0 : i32, i32
  }
  func.func @transform_3(%arg0: i32) -> (i32, i32) {
    %c0_i32 = arith.constant 0 : i32
    %c0_i32_0 = arith.constant 0 : i32
    %c0_i32_1 = arith.constant 0 : i32
    return %c0_i32, %c0_i32_0 : i32, i32
  }
  func.func @transform_4(%arg0: i32) -> (i32, i32) {
    %c0_i32 = arith.constant 0 : i32
    %c0_i32_0 = arith.constant 0 : i32
    %c0_i32_1 = arith.constant 0 : i32
    return %c0_i32, %c0_i32_0 : i32, i32
  }
  func.func @transform_5(%arg0: i32) -> (i32, i32) {
    %c0_i32 = arith.constant 0 : i32
    %c0_i32_0 = arith.constant 0 : i32
    %c0_i32_1 = arith.constant 0 : i32
    return %c0_i32, %c0_i32_0 : i32, i32
  }
  func.func @transform_6(%arg0: i32) -> (i32, i32) {
    %c0_i32 = arith.constant 0 : i32
    %c0_i32_0 = arith.constant 0 : i32
    %c0_i32_1 = arith.constant 0 : i32
    return %c0_i32, %c0_i32_0 : i32, i32
  }
  func.func @transform_7(%arg0: i32) -> (i32, i32) {
    %c0_i32 = arith.constant 0 : i32
    %c0_i32_0 = arith.constant 0 : i32
    %c0_i32_1 = arith.constant 0 : i32
    return %c0_i32, %c0_i32_0 : i32, i32
  }
  func.func @transform_8(%arg0: i32) -> (i32, i32) {
    %c0_i32 = arith.constant 0 : i32
    %c0_i32_0 = arith.constant 0 : i32
    %c0_i32_1 = arith.constant 0 : i32
    return %c0_i32, %c0_i32_0 : i32, i32
  }
  func.func @transform_9(%arg0: i32) -> (i32, i32, i32) {
    %c0_i32 = arith.constant 0 : i32
    %c0_i32_0 = arith.constant 0 : i32
    %c0_i32_1 = arith.constant 0 : i32
    return %arg0, %c0_i32, %c0_i32_0 : i32, i32, i32
  }
}

</mosaic_0001>

<bundles_post_ra>
// kernel: tpu_custom_call.1
= control target key start
LH: loop header
LB: loop body
LE: loop exit
PB: predicated region body
PF: predicated region fallthrough
CT: control target
= control target key end

     0   :  { %s1746_s0 = inlined_call_operand.vmem [shape: f32[203,32], index: 0, kind: input, shape index: {}]   ;;  %s1747_s1 = inlined_call_operand.vmem [shape: bf16[32,128], index: 1, kind: input, shape index: {}]   ;;  %s1748_s2 = inlined_call_operand.vmem [shape: f32[1,128], index: 2, kind: input, shape index: {}]   ;;  %s1749_s3 = inlined_call_operand.vmem [shape: bf16[128,128], index: 3, kind: input, shape index: {}]   ;;  %s1750_s4 = inlined_call_operand.vmem [shape: f32[1,128], index: 4, kind: input, shape index: {}]   ;;  %s1751_s5 = inlined_call_operand.vmem [shape: bf16[128,128], index: 5, kind: input, shape index: {}]   ;;  %s1752_s6 = inlined_call_operand.vmem [shape: f32[1,128], index: 6, kind: input, shape index: {}]   ;;  %s1753_s7 = inlined_call_operand.vmem [shape: f32[1,128], index: 7, kind: input, shape index: {}]   ;;  %s1754_s8 = inlined_call_operand.<no memory space> [shape: f32[1,1], index: 8, kind: input, shape index: {}]   ;;  %s1755_s9 = inlined_call_operand.hbm [shape: f32[1,1,208], index: 9, kind: output, shape index: {}]  }
   0x1   :  { %v14_v0 = vstv %s1754_s8 }
   0x2   :  { %15 = vst [vmem:[#allocation2] sm:$0x1] %v14_v0 }
   0x3   :  { %v1207_v1 = vld [vmem:[%s1747_s1 + $0x8] sm:$0xff]   ;;  %v1247_v2 = vmov 0.0   ;;  %v1208_v3 = vld [vmem:[%s1747_s1] sm:$0xff]   ;;  %vm1248_vm0 = vmmov 0   ;;  %vm98_vm1 = vcmask 261120   ;;  %v50_v7 = vld [vmem:[%s1746_s0 + $0x70] sm:$0xff] }
   0x4   :  { %1005 = vmatprep.subr.bf16.mxu0 %v1247_v2  ;;  %1197 = vmatprep.subr.bf16.mxu1 %v1247_v2  ;;  %v36_v4 = vld [vmem:[%s1746_s0] sm:$0xff]  ;;  %v37_v5 = vld [vmem:[%s1746_s0 + $0x8] sm:$0xff]  ;;  %v51_v8 = vld [vmem:[%s1746_s0 + $0x78] sm:$0xff] }
   0x5   :  { %1006 = vmatpush3.bf16.msra.mxu0 %v1207_v1  ;;  %1009 = vmatprep.mubr.msk.bf16.mxu0 %vm1248_vm0, %v1247_v2  ;;  %v62_v6 = vpack.c.bf16 %v37_v5, %v36_v4  ;;  %v69_v9 = vpack.c.bf16 %v51_v8, %v50_v7  ;;  %v38_v10 = vld [vmem:[%s1746_s0 + $0x10] sm:$0xff]  ;;  %v39_v11 = vld [vmem:[%s1746_s0 + $0x18] sm:$0xff]  ;;  %v52_v12 = vld [vmem:[%s1746_s0 + $0x80] sm:$0xff] }
   0x6   :  { %1007 = vmatprep.subr.bf16.mxu0 %v1247_v2  ;;  %1199 = vmatpush3.bf16.msra.mxu1 %v1207_v1  ;;  %v53_v13 = vld [vmem:[%s1746_s0 + $0x88] sm:$0xff]  ;;  %v1209_v14 = vld [vmem:[%s1749_s3 + $0x38] sm:$0xff]   ;;  %v63_v15 = vpack.c.bf16 %v39_v11, %v38_v10  ;;  %v1210_v16 = vld [vmem:[%s1749_s3 + $0x30] sm:$0xff]  }
   0x7   :  { %1198 = vmatprep.subr.bf16.mxu1 %v1247_v2  ;;  %1037 = vmatprep.mubr.msk.bf16.mxu1 %vm1248_vm0, %v1247_v2  ;;  %v70_v17 = vpack.c.bf16 %v53_v13, %v52_v12  ;;  %v40_v18 = vld [vmem:[%s1746_s0 + $0x20] sm:$0xff]  ;;  %v41_v19 = vld [vmem:[%s1746_s0 + $0x28] sm:$0xff]  ;;  %v54_v21 = vld [vmem:[%s1746_s0 + $0x90] sm:$0xff] }
   0x8   :  { %v1211_v20 = vld [vmem:[%s1749_s3 + $0x28] sm:$0xff]   ;;  %v55_v22 = vld [vmem:[%s1746_s0 + $0x98] sm:$0xff]  ;;  %v1212_v23 = vld [vmem:[%s1749_s3 + $0x20] sm:$0xff]   ;;  %v64_v24 = vpack.c.bf16 %v41_v19, %v40_v18 }
   0x9   :  { %1008 = vmatpush3.bf16.msra.mxu0 %v1208_v3  ;;  %v71_v25 = vpack.c.bf16 %v55_v22, %v54_v21 }
   0xa   :  { %1200 = vmatpush3.bf16.msra.mxu1 %v1208_v3  ;;  %1129 = vmatprep.subr.bf16.mxu0 %v1247_v2 }
   0xb   :  { %1061 = vmatprep.subr.bf16.mxu1 %v1247_v2 }
   0xc   :  { %1010 = vmatmul.mubr.msk.bf16.vlgmr.msra.gmra.mxu0 %vm98_vm1, %v62_v6 }
   0xd   :  { %1013 = vmatprep.mubr.msk.bf16.mxu0 %vm1248_vm0, %v1247_v2  ;;  %1038 = vmatmul.mubr.msk.bf16.vlgmr.msra.gmra.mxu1 %vm98_vm1, %v69_v9 }
   0xe   :  { %1041 = vmatprep.mubr.msk.bf16.mxu1 %vm1248_vm0, %v1247_v2  ;;  %1062 = vmatpush3.bf16.msra.mxu1 %v1209_v14 }
   0xf   :  { %1063 = vmatprep.subr.bf16.mxu1 %v1247_v2 }
  0x12   :  { %1064 = vmatpush3.bf16.msra.mxu1 %v1210_v16 }
  0x13   :  { %1065 = vmatprep.subr.bf16.mxu1 %v1247_v2 }
  0x14   :  { %1014 = vmatmul.mubr.msk.bf16.gmra.mxu0 %vm98_vm1, %v63_v15 }
  0x15   :  { %1017 = vmatprep.mubr.msk.bf16.mxu0 %vm1248_vm0, %v1247_v2  ;;  %1042 = vmatmul.mubr.msk.bf16.gmra.mxu1 %vm98_vm1, %v70_v17 }
  0x16   :  { %1045 = vmatprep.mubr.msk.bf16.mxu1 %vm1248_vm0, %v1247_v2  ;;  %1066 = vmatpush3.bf16.msra.mxu1 %v1211_v20 }
  0x17   :  { %1067 = vmatprep.subr.bf16.mxu1 %v1247_v2 }
  0x18   :  { %16 = vsyncpa [#allocation4], 0  ;;  %v1213_v26 = vld [vmem:[%s1749_s3 + $0x18] sm:$0xff]   ;;  %v42_v27 = vld [vmem:[%s1746_s0 + $0x30] sm:$0xff]  ;;  %s1251_s30 = smov [#allocation3]  }
  0x19   :  { %v43_v28 = vld [vmem:[%s1746_s0 + $0x38] sm:$0xff]  ;;  %v56_v29 = vld [vmem:[%s1746_s0 + $0xa0] sm:$0xff]  ;;  %v57_v30 = vld [vmem:[%s1746_s0 + $0xa8] sm:$0xff]  ;;  %s906_s10 = sshll.u32 %s1251_s30, 4  ;;  %s907_s10 = int_to_ptr.vmem [resolvable:$true] %s906_s10 }
  0x1a   :  { %1068 = vmatpush3.bf16.msra.mxu1 %v1212_v23  ;;  %v65_v31 = vpack.c.bf16 %v43_v28, %v42_v27  ;;  %v1214_v32 = vld [vmem:[%s1749_s3 + $0x10] sm:$0xff]   ;;  %v72_v33 = vpack.c.bf16 %v57_v30, %v56_v29  ;;  %v44_v34 = vld [vmem:[%s1746_s0 + $0x40] sm:$0xff]  ;;  %v45_v35 = vld [vmem:[%s1746_s0 + $0x48] sm:$0xff]  ;;  %p1230_p1 = scmp.lt.s32.totalorder %s907_s10, %s907_s10 }
  0x1b   :  { %1069 = vmatprep.subr.bf16.mxu1 %v1247_v2  ;;  %v58_v36 = vld [vmem:[%s1746_s0 + $0xb0] sm:$0xff]  ;;  %v59_v37 = vld [vmem:[%s1746_s0 + $0xb8] sm:$0xff]  ;;  %v66_v38 = vpack.c.bf16 %v45_v35, %v44_v34  ;;  %v60_v42 = vld [vmem:[%s1746_s0 + $0xc0] sm:$0xff] }
  0x1c   :  { %1018 = vmatmul.mubr.msk.bf16.gmra.mxu0 %vm98_vm1, %v64_v24  ;;  %v73_v39 = vpack.c.bf16 %v59_v37, %v58_v36  ;;  %v46_v40 = vld [vmem:[%s1746_s0 + $0x50] sm:$0xff]  ;;  %v47_v41 = vld [vmem:[%s1746_s0 + $0x58] sm:$0xff]  ;;  %v61_v43 = vld [vmem:[%s1746_s0 + $0xc8] sm:$0xff] }
  0x1d   :  { %1021 = vmatprep.mubr.msk.bf16.mxu0 %vm1248_vm0, %v1247_v2  ;;  %1046 = vmatmul.mubr.msk.bf16.gmra.mxu1 %vm98_vm1, %v71_v25  ;;  %v67_v44 = vpack.c.bf16 %v47_v41, %v46_v40  ;;  %v74_v45 = vpack.c.bf16 %v61_v43, %v60_v42  ;;  %v48_v46 = vld [vmem:[%s1746_s0 + $0x60] sm:$0xff]  ;;  %v49_v47 = vld [vmem:[%s1746_s0 + $0x68] sm:$0xff]  ;;  %v1217_v51 = vld [vmem:[%s1751_s5 + $0x38] sm:$0xff]  }
  0x1e   :  { %1049 = vmatprep.mubr.msk.bf16.mxu1 %vm1248_vm0, %v1247_v2  ;;  %1070 = vmatpush3.bf16.msra.mxu1 %v1213_v26  ;;  %v68_v48 = vpack.c.bf16 %v49_v47, %v48_v46  ;;  %v1215_v49 = vld [vmem:[%s1749_s3 + $0x8] sm:$0xff]   ;;  %v1216_v50 = vld [vmem:[%s1749_s3] sm:$0xff]   ;;  %v1218_v52 = vld [vmem:[%s1751_s5 + $0x30] sm:$0xff]  }
  0x1f   :  { %1071 = vmatprep.subr.bf16.mxu1 %v1247_v2  ;;  %1130 = vmatpush3.bf16.msra.mxu0 %v1217_v51  ;;  %v1219_v53 = vld [vmem:[%s1751_s5 + $0x28] sm:$0xff]   ;;  %v1220_v54 = vld [vmem:[%s1751_s5 + $0x20] sm:$0xff]   ;;  %v1221_v55 = vld [vmem:[%s1751_s5 + $0x18] sm:$0xff]  }
  0x20   :  { %1131 = vmatprep.subr.bf16.mxu0 %v1247_v2  ;;  %v1222_v56 = vld [vmem:[%s1751_s5 + $0x10] sm:$0xff]   ;;  %v1496_v57 = vld [vmem:[%s1748_s2] ss:$0 sm:$0xff]  ;;  %v1223_v60 = vld [vmem:[%s1751_s5 + $0x8] sm:$0xff]  }
  0x22   :  { %1072 = vmatpush3.bf16.msra.mxu1 %v1214_v32 }
  0x23   :  { %1073 = vmatprep.subr.bf16.mxu1 %v1247_v2  ;;  %1132 = vmatpush3.bf16.msra.mxu0 %v1218_v52 }
  0x24   :  { %1022 = vmatmul.mubr.msk.bf16.gmra.mxu0 %vm98_vm1, %v65_v31  ;;  %1133 = vmatprep.subr.bf16.mxu0 %v1247_v2 }
  0x25   :  { %1025 = vmatprep.mubr.msk.bf16.mxu0 %vm1248_vm0, %v1247_v2  ;;  %1050 = vmatmul.mubr.msk.bf16.gmra.mxu1 %vm98_vm1, %v72_v33 }
  0x26   :  { %1053 = vmatprep.mubr.msk.bf16.mxu1 %vm1248_vm0, %v1247_v2  ;;  %1074 = vmatpush3.bf16.msra.mxu1 %v1215_v49 }
  0x27   :  { %1075 = vmatprep.subr.bf16.mxu1 %v1247_v2  ;;  %1134 = vmatpush3.bf16.msra.mxu0 %v1219_v53 }
  0x28   :  { %1135 = vmatprep.subr.bf16.mxu0 %v1247_v2 }
  0x2a   :  { %1076 = vmatpush3.bf16.msra.mxu1 %v1216_v50 }
  0x2b   :  { %806 = vmatprep.subr.mxu1 %v1247_v2  ;;  %1136 = vmatpush3.bf16.msra.mxu0 %v1220_v54 }
  0x2c   :  { %1026 = vmatmul.mubr.msk.bf16.gmra.mxu0 %vm98_vm1, %v66_v38  ;;  %1137 = vmatprep.subr.bf16.mxu0 %v1247_v2 }
  0x2d   :  { %1029 = vmatprep.mubr.msk.bf16.mxu0 %vm1248_vm0, %v1247_v2  ;;  %1054 = vmatmul.mubr.msk.bf16.gmra.mxu1 %vm98_vm1, %v73_v39 }
  0x2e   :  { %1057 = vmatprep.mubr.msk.bf16.mxu1 %vm1248_vm0, %v1247_v2 }
  0x2f   :  { %1138 = vmatpush3.bf16.msra.mxu0 %v1221_v55 }
  0x30   :  { %1139 = vmatprep.subr.bf16.mxu0 %v1247_v2 }
  0x33   :  { %1140 = vmatpush3.bf16.msra.mxu0 %v1222_v56 }
  0x34   :  { %1030 = vmatmul.mubr.msk.bf16.gmra.mxu0 %vm98_vm1, %v67_v44  ;;  %1141 = vmatprep.subr.bf16.mxu0 %v1247_v2 }
  0x35   :  { %1033 = vmatprep.mubr.msk.bf16.mxu0 %vm1248_vm0, %v1247_v2  ;;  %1058 = vmatmul.mubr.msk.bf16.gmra.mxu1 %vm98_vm1, %v74_v45 }
  0x36   :  { %1077 = vmatprep.mubr.msk.bf16.mxu1 %vm1248_vm0, %v1247_v2 }
  0x37   :  { %1142 = vmatpush3.bf16.msra.mxu0 %v1223_v60 }
  0x38   :  { %1143 = vmatprep.subr.bf16.mxu0 %v1247_v2 }
  0x3c   :  { %1034 = vmatmul.mubr.msk.bf16.gmra.mxu0 %vm98_vm1, %v68_v48 }
  0x3d   :  { %1145 = vmatprep.mubr.msk.bf16.mxu0 %vm1248_vm0, %v1247_v2 }
  0xcc   :  { %v172_v58 = vpop.f32.mrf.mxu0 }
  0xcd   :  { %v1498_v59 = vpop.f32.mrf.mxu1  ;;  %v173_v62 = vadd.f32 %v1496_v57, %v172_v58 }
  0xce   :  { %v1011_v61 = vpop.f32.mrf.mxu0 }
  0xcf   :  { %v1039_v63 = vpop.f32.mrf.mxu1  ;;  %v275_v5 = vmax.f32 %v173_v62, 0.0 }
  0xd0   :  { %v175_v0 = vpop.f32.mrf.mxu0 }
  0xd1   :  { %v176_v1 = vadd.f32 %v1496_v57, %v175_v0  ;;  %v1506_v3 = vpop.f32.mrf.mxu1 }
  0xd2   :  { %v1012_v4 = vpop.f32.mrf.mxu0 }
  0xd3   :  { %v276_v6 = vmax.f32 %v176_v1, 0.0  ;;  %v1040_v7 = vpop.f32.mrf.mxu1 }
  0xd4   :  { %v180_v8 = vpop.f32.mrf.mxu0 }
  0xd5   :  { %v301_v9 = vpack.c.bf16 %v276_v6, %v275_v5  ;;  %v1509_v10 = vpop.f32.mrf.mxu1  ;;  %v181_v12 = vadd.f32 %v1496_v57, %v180_v8 }
  0xd6   :  { %v1015_v11 = vpop.f32.mrf.mxu0 }
  0xd7   :  { %1078 = vmatmul.mubr.bf16.vlgmr.msra.gmra.mxu1 %v301_v9  ;;  %v1043_v13 = vpop.f32.mrf.mxu1  ;;  %v277_v18 = vmax.f32 %v181_v12, 0.0 }
  0xd8   :  { %v183_v14 = vpop.f32.mrf.mxu0  ;;  %1081 = vmatprep.mubr.msk.bf16.mxu1 %vm1248_vm0, %v1247_v2 }
  0xd9   :  { %v184_v15 = vadd.f32 %v1496_v57, %v183_v14  ;;  %v1515_v16 = vpop.f32.mrf.mxu1 }
  0xda   :  { %v1016_v17 = vpop.f32.mrf.mxu0 }
  0xdb   :  { %v278_v19 = vmax.f32 %v184_v15, 0.0  ;;  %v1044_v20 = vpop.f32.mrf.mxu1 }
  0xdc   :  { %v188_v21 = vpop.f32.mrf.mxu0 }
  0xdd   :  { %v302_v22 = vpack.c.bf16 %v278_v19, %v277_v18  ;;  %v1517_v23 = vpop.f32.mrf.mxu1  ;;  %v189_v25 = vadd.f32 %v1496_v57, %v188_v21 }
  0xde   :  { %v1019_v24 = vpop.f32.mrf.mxu0 }
  0xdf   :  { %1082 = vmatmul.mubr.bf16.gmra.mxu1 %v302_v22  ;;  %v1047_v26 = vpop.f32.mrf.mxu1  ;;  %v279_v31 = vmax.f32 %v189_v25, 0.0  ;;  %v229_v25 = vadd.f32 %v1496_v57, %v1498_v59 }
  0xe0   :  { %v191_v27 = vpop.f32.mrf.mxu0  ;;  %1085 = vmatprep.mubr.msk.bf16.mxu1 %vm1248_vm0, %v1247_v2 }
  0xe1   :  { %v192_v28 = vadd.f32 %v1496_v57, %v191_v27  ;;  %v1523_v29 = vpop.f32.mrf.mxu1  ;;  %v232_v27 = vadd.f32 %v1496_v57, %v1506_v3 }
  0xe2   :  { %v1020_v30 = vpop.f32.mrf.mxu0 }
  0xe3   :  { %v280_v32 = vmax.f32 %v192_v28, 0.0  ;;  %v1048_v33 = vpop.f32.mrf.mxu1  ;;  %v289_v28 = vmax.f32 %v229_v25, 0.0  ;;  %v290_v30 = vmax.f32 %v232_v27, 0.0 }
  0xe4   :  { %v196_v34 = vpop.f32.mrf.mxu0 }
  0xe5   :  { %v303_v35 = vpack.c.bf16 %v280_v32, %v279_v31  ;;  %v1525_v36 = vpop.f32.mrf.mxu1  ;;  %v197_v38 = vadd.f32 %v1496_v57, %v196_v34  ;;  %v237_v31 = vadd.f32 %v1496_v57, %v1509_v10  ;;  %v240_v32 = vadd.f32 %v1496_v57, %v1515_v16 }
  0xe6   :  { %v1023_v37 = vpop.f32.mrf.mxu0  ;;  %v308_v33 = vpack.c.bf16 %v290_v30, %v289_v28 }
  0xe7   :  { %1086 = vmatmul.mubr.bf16.gmra.mxu1 %v303_v35  ;;  %v1051_v39 = vpop.f32.mrf.mxu1  ;;  %v281_v44 = vmax.f32 %v197_v38, 0.0  ;;  %v291_v34 = vmax.f32 %v237_v31, 0.0  ;;  %v292_v59 = vmax.f32 %v240_v32, 0.0  ;;  %v245_v35 = vadd.f32 %v1496_v57, %v1517_v23  ;;  %v1224_v23 = vld [vmem:[%s1751_s5] sm:$0xff]  }
  0xe8   :  { %v199_v40 = vpop.f32.mrf.mxu0  ;;  %1089 = vmatprep.mubr.msk.bf16.mxu1 %vm1248_vm0, %v1247_v2  ;;  %v248_v37 = vadd.f32 %v1496_v57, %v1523_v29  ;;  %v253_v39 = vadd.f32 %v1496_v57, %v1525_v36  ;;  %1144 = vmatpush3.bf16.msra.mxu0 %v1224_v23 }
  0xe9   :  { %v200_v41 = vadd.f32 %v1496_v57, %v199_v40  ;;  %v1531_v42 = vpop.f32.mrf.mxu1  ;;  %v309_v3 = vpack.c.bf16 %v292_v59, %v291_v34  ;;  %v293_v38 = vmax.f32 %v245_v35, 0.0 }
  0xea   :  { %v1024_v43 = vpop.f32.mrf.mxu0  ;;  %v294_v10 = vmax.f32 %v248_v37, 0.0  ;;  %v256_v40 = vadd.f32 %v1496_v57, %v1531_v42 }
  0xeb   :  { %v282_v45 = vmax.f32 %v200_v41, 0.0  ;;  %v1052_v46 = vpop.f32.mrf.mxu1  ;;  %v295_v41 = vmax.f32 %v253_v39, 0.0 }
  0xec   :  { %v204_v47 = vpop.f32.mrf.mxu0  ;;  %v310_v16 = vpack.c.bf16 %v294_v10, %v293_v38  ;;  %v296_v29 = vmax.f32 %v256_v40, 0.0 }
  0xed   :  { %v304_v48 = vpack.c.bf16 %v282_v45, %v281_v44  ;;  %v1533_v49 = vpop.f32.mrf.mxu1  ;;  %v205_v51 = vadd.f32 %v1496_v57, %v204_v47 }
  0xee   :  { %v1027_v50 = vpop.f32.mrf.mxu0  ;;  %v311_v43 = vpack.c.bf16 %v296_v29, %v295_v41  ;;  %v261_v44 = vadd.f32 %v1496_v57, %v1533_v49 }
  0xef   :  { %1090 = vmatmul.mubr.bf16.gmra.mxu1 %v304_v48  ;;  %v1055_v52 = vpop.f32.mrf.mxu1  ;;  %v283_v58 = vmax.f32 %v205_v51, 0.0 }
  0xf0   :  { %v207_v53 = vpop.f32.mrf.mxu0  ;;  %1093 = vmatprep.mubr.msk.bf16.mxu1 %vm1248_vm0, %v1247_v2  ;;  %v297_v45 = vmax.f32 %v261_v44, 0.0  ;;  %v1590_v52 = vld [vmem:[%s1750_s4] ss:$0 sm:$0xff] }
  0xf1   :  { %v208_v54 = vadd.f32 %v1496_v57, %v207_v53  ;;  %v1539_v55 = vpop.f32.mrf.mxu1 }
  0xf2   :  { %v1028_v56 = vpop.f32.mrf.mxu0  ;;  %v264_v36 = vadd.f32 %v1496_v57, %v1539_v55 }
  0xf3   :  { %v284_v60 = vmax.f32 %v208_v54, 0.0  ;;  %v1056_v61 = vpop.f32.mrf.mxu1 }
  0xf4   :  { %v212_v62 = vpop.f32.mrf.mxu0  ;;  %v298_v42 = vmax.f32 %v264_v36, 0.0 }
  0xf5   :  { %v305_v63 = vpack.c.bf16 %v284_v60, %v283_v58  ;;  %v268_v0 = vpop.f32.mrf.mxu1  ;;  %v213_v4 = vadd.f32 %v1496_v57, %v212_v62 }
  0xf6   :  { %v1031_v1 = vpop.f32.mrf.mxu0  ;;  %v312_v46 = vpack.c.bf16 %v298_v42, %v297_v45  ;;  %v269_v47 = vadd.f32 %v1496_v57, %v268_v0 }
  0xf7   :  { %1094 = vmatmul.mubr.bf16.gmra.mxu1 %v305_v63  ;;  %v1059_v5 = vpop.f32.mrf.mxu1  ;;  %v285_v11 = vmax.f32 %v213_v4, 0.0 }
  0xf8   :  { %v215_v6 = vpop.f32.mrf.mxu0  ;;  %1097 = vmatprep.mubr.msk.bf16.mxu1 %vm1248_vm0, %v1247_v2  ;;  %v299_v50 = vmax.f32 %v269_v47, 0.0 }
  0xf9   :  { %v216_v7 = vadd.f32 %v1496_v57, %v215_v6  ;;  %v271_v8 = vpop.f32.mrf.mxu1 }
  0xfa   :  { %v1032_v9 = vpop.f32.mrf.mxu0  ;;  %v272_v48 = vadd.f32 %v1496_v57, %v271_v8 }
  0xfb   :  { %v286_v12 = vmax.f32 %v216_v7, 0.0  ;;  %v1060_v13 = vpop.f32.mrf.mxu1 }
  0xfc   :  { %v220_v14 = vpop.f32.mrf.mxu0  ;;  %v300_v51 = vmax.f32 %v272_v48, 0.0 }
  0xfd   :  { %v306_v15 = vpack.c.bf16 %v286_v12, %v285_v11  ;;  %v221_v18 = vadd.f32 %v1496_v57, %v220_v14 }
  0xfe   :  { %v1035_v17 = vpop.f32.mrf.mxu0  ;;  %v313_v49 = vpack.c.bf16 %v300_v51, %v299_v50 }
  0xff   :  { %1098 = vmatmul.mubr.bf16.gmra.mxu1 %v306_v15  ;;  %v287_v22 = vmax.f32 %v221_v18, 0.0 }
 0x100   :  { %v223_v19 = vpop.f32.mrf.mxu0  ;;  %1101 = vmatprep.mubr.msk.bf16.mxu1 %vm1248_vm0, %v1247_v2 }
 0x101   :  { %v224_v20 = vadd.f32 %v1496_v57, %v223_v19 }
 0x102   :  { %v1036_v21 = vpop.f32.mrf.mxu0 }
 0x103   :  { %v288_v24 = vmax.f32 %v224_v20, 0.0 }
 0x105   :  { %v307_v26 = vpack.c.bf16 %v288_v24, %v287_v22 }
 0x107   :  { %1102 = vmatmul.mubr.bf16.gmra.mxu1 %v307_v26 }
 0x108   :  { %1105 = vmatprep.mubr.msk.bf16.mxu1 %vm1248_vm0, %v1247_v2 }
 0x10f   :  { %1106 = vmatmul.mubr.bf16.gmra.mxu1 %v308_v33 }
 0x110   :  { %1109 = vmatprep.mubr.msk.bf16.mxu1 %vm1248_vm0, %v1247_v2 }
 0x117   :  { %1110 = vmatmul.mubr.bf16.gmra.mxu1 %v309_v3 }
 0x118   :  { %1113 = vmatprep.mubr.msk.bf16.mxu1 %vm1248_vm0, %v1247_v2 }
 0x11f   :  { %1114 = vmatmul.mubr.bf16.gmra.mxu1 %v310_v16 }
 0x120   :  { %1117 = vmatprep.mubr.msk.bf16.mxu1 %vm1248_vm0, %v1247_v2 }
 0x127   :  { %1118 = vmatmul.mubr.bf16.gmra.mxu1 %v311_v43 }
 0x128   :  { %1121 = vmatprep.mubr.msk.bf16.mxu1 %vm1248_vm0, %v1247_v2 }
 0x12f   :  { %1122 = vmatmul.mubr.bf16.gmra.mxu1 %v312_v46 }
 0x130   :  { %1125 = vmatprep.mubr.msk.bf16.mxu1 %vm1248_vm0, %v1247_v2 }
 0x137   :  { %1126 = vmatmul.mubr.bf16.gmra.mxu1 %v313_v49 }
 0x138   :  { %870 = vmatprep.mubr.f32.mxu1 %v1247_v2 }
 0x197   :  { %v419_v53 = vpop.f32.mrf.mxu1 }
 0x198   :  { %v420_v55 = vadd.f32 %v1590_v52, %v419_v53 }
 0x199   :  { %v1079_v54 = vpop.f32.mrf.mxu1 }
 0x19a   :  { %v522_v60 = vmax.f32 %v420_v55, 0.0 }
 0x19b   :  { %v422_v57 = vpop.f32.mrf.mxu1 }
 0x19c   :  { %v423_v56 = vadd.f32 %v1590_v52, %v422_v57 }
 0x19d   :  { %v1080_v58 = vpop.f32.mrf.mxu1 }
 0x19e   :  { %v523_v61 = vmax.f32 %v423_v56, 0.0 }
 0x19f   :  { %v427_v62 = vpop.f32.mrf.mxu1 }
 0x1a0   :  { %v548_v63 = vpack.c.bf16 %v523_v61, %v522_v60  ;;  %v428_v1 = vadd.f32 %v1590_v52, %v427_v62 }
 0x1a1   :  { %v1083_v0 = vpop.f32.mrf.mxu1 }
 0x1a2   :  { %1146 = vmatmul.mubr.bf16.vlgmr.msra.gmra.mxu0 %v548_v63  ;;  %v524_v7 = vmax.f32 %v428_v1, 0.0 }
 0x1a3   :  { %v430_v4 = vpop.f32.mrf.mxu1  ;;  %1149 = vmatprep.mubr.msk.bf16.mxu0 %vm1248_vm0, %v1247_v2 }
 0x1a4   :  { %v431_v5 = vadd.f32 %v1590_v52, %v430_v4 }
 0x1a5   :  { %v1084_v6 = vpop.f32.mrf.mxu1 }
 0x1a6   :  { %v525_v8 = vmax.f32 %v431_v5, 0.0 }
 0x1a7   :  { %v435_v9 = vpop.f32.mrf.mxu1 }
 0x1a8   :  { %v549_v11 = vpack.c.bf16 %v525_v8, %v524_v7  ;;  %v436_v13 = vadd.f32 %v1590_v52, %v435_v9 }
 0x1a9   :  { %v1087_v12 = vpop.f32.mrf.mxu1 }
 0x1aa   :  { %1150 = vmatmul.mubr.bf16.gmra.mxu0 %v549_v11  ;;  %v526_v18 = vmax.f32 %v436_v13, 0.0 }
 0x1ab   :  { %v438_v14 = vpop.f32.mrf.mxu1  ;;  %1153 = vmatprep.mubr.msk.bf16.mxu0 %vm1248_vm0, %v1247_v2 }
 0x1ac   :  { %v439_v15 = vadd.f32 %v1590_v52, %v438_v14 }
 0x1ad   :  { %v1088_v17 = vpop.f32.mrf.mxu1 }
 0x1ae   :  { %v527_v19 = vmax.f32 %v439_v15, 0.0 }
 0x1af   :  { %v443_v20 = vpop.f32.mrf.mxu1 }
 0x1b0   :  { %v550_v21 = vpack.c.bf16 %v527_v19, %v526_v18  ;;  %v444_v24 = vadd.f32 %v1590_v52, %v443_v20 }
 0x1b1   :  { %v1091_v22 = vpop.f32.mrf.mxu1 }
 0x1b2   :  { %1154 = vmatmul.mubr.bf16.gmra.mxu0 %v550_v21  ;;  %v528_v28 = vmax.f32 %v444_v24, 0.0 }
 0x1b3   :  { %v446_v25 = vpop.f32.mrf.mxu1  ;;  %1157 = vmatprep.mubr.msk.bf16.mxu0 %vm1248_vm0, %v1247_v2 }
 0x1b4   :  { %v447_v26 = vadd.f32 %v1590_v52, %v446_v25 }
 0x1b5   :  { %v1092_v27 = vpop.f32.mrf.mxu1 }
 0x1b6   :  { %v529_v30 = vmax.f32 %v447_v26, 0.0 }
 0x1b7   :  { %v451_v31 = vpop.f32.mrf.mxu1 }
 0x1b8   :  { %v551_v32 = vpack.c.bf16 %v529_v30, %v528_v28  ;;  %v452_v34 = vadd.f32 %v1590_v52, %v451_v31 }
 0x1b9   :  { %v1095_v33 = vpop.f32.mrf.mxu1 }
 0x1ba   :  { %1158 = vmatmul.mubr.bf16.gmra.mxu0 %v551_v32  ;;  %v530_v37 = vmax.f32 %v452_v34, 0.0 }
 0x1bb   :  { %v454_v59 = vpop.f32.mrf.mxu1  ;;  %1161 = vmatprep.mubr.msk.bf16.mxu0 %vm1248_vm0, %v1247_v2 }
 0x1bc   :  { %v455_v3 = vadd.f32 %v1590_v52, %v454_v59 }
 0x1bd   :  { %v1096_v35 = vpop.f32.mrf.mxu1 }
 0x1be   :  { %v531_v38 = vmax.f32 %v455_v3, 0.0 }
 0x1bf   :  { %v459_v10 = vpop.f32.mrf.mxu1 }
 0x1c0   :  { %v552_v16 = vpack.c.bf16 %v531_v38, %v530_v37  ;;  %v460_v40 = vadd.f32 %v1590_v52, %v459_v10 }
 0x1c1   :  { %v1099_v39 = vpop.f32.mrf.mxu1 }
 0x1c2   :  { %1162 = vmatmul.mubr.bf16.gmra.mxu0 %v552_v16  ;;  %v532_v43 = vmax.f32 %v460_v40, 0.0 }
 0x1c3   :  { %v462_v23 = vpop.f32.mrf.mxu1  ;;  %1165 = vmatprep.mubr.msk.bf16.mxu0 %vm1248_vm0, %v1247_v2 }
 0x1c4   :  { %v463_v41 = vadd.f32 %v1590_v52, %v462_v23 }
 0x1c5   :  { %v1100_v29 = vpop.f32.mrf.mxu1 }
 0x1c6   :  { %v533_v44 = vmax.f32 %v463_v41, 0.0 }
 0x1c7   :  { %v467_v36 = vpop.f32.mrf.mxu1 }
 0x1c8   :  { %v553_v45 = vpack.c.bf16 %v533_v44, %v532_v43  ;;  %v468_v46 = vadd.f32 %v1590_v52, %v467_v36 }
 0x1c9   :  { %v1103_v42 = vpop.f32.mrf.mxu1 }
 0x1ca   :  { %1166 = vmatmul.mubr.bf16.gmra.mxu0 %v553_v45  ;;  %v534_v51 = vmax.f32 %v468_v46, 0.0 }
 0x1cb   :  { %v470_v47 = vpop.f32.mrf.mxu1  ;;  %1169 = vmatprep.mubr.msk.bf16.mxu0 %vm1248_vm0, %v1247_v2 }
 0x1cc   :  { %v471_v48 = vadd.f32 %v1590_v52, %v470_v47 }
 0x1cd   :  { %v1104_v50 = vpop.f32.mrf.mxu1 }
 0x1ce   :  { %v535_v49 = vmax.f32 %v471_v48, 0.0 }
 0x1cf   :  { %v475_v53 = vpop.f32.mrf.mxu1 }
 0x1d0   :  { %v554_v54 = vpack.c.bf16 %v535_v49, %v534_v51  ;;  %v476_v57 = vadd.f32 %v1590_v52, %v475_v53 }
 0x1d1   :  { %v1107_v55 = vpop.f32.mrf.mxu1 }
 0x1d2   :  { %1170 = vmatmul.mubr.bf16.gmra.mxu0 %v554_v54  ;;  %v536_v61 = vmax.f32 %v476_v57, 0.0 }
 0x1d3   :  { %v478_v56 = vpop.f32.mrf.mxu1  ;;  %1173 = vmatprep.mubr.msk.bf16.mxu0 %vm1248_vm0, %v1247_v2 }
 0x1d4   :  { %v479_v58 = vadd.f32 %v1590_v52, %v478_v56 }
 0x1d5   :  { %v1108_v60 = vpop.f32.mrf.mxu1 }
 0x1d6   :  { %v537_v62 = vmax.f32 %v479_v58, 0.0 }
 0x1d7   :  { %v483_v63 = vpop.f32.mrf.mxu1 }
 0x1d8   :  { %v555_v0 = vpack.c.bf16 %v537_v62, %v536_v61  ;;  %v484_v1 = vadd.f32 %v1590_v52, %v483_v63 }
 0x1d9   :  { %v1111_v4 = vpop.f32.mrf.mxu1 }
 0x1da   :  { %1174 = vmatmul.mubr.bf16.gmra.mxu0 %v555_v0  ;;  %v538_v6 = vmax.f32 %v484_v1, 0.0 }
 0x1db   :  { %v486_v5 = vpop.f32.mrf.mxu1  ;;  %1177 = vmatprep.mubr.msk.bf16.mxu0 %vm1248_vm0, %v1247_v2 }
 0x1dc   :  { %v487_v7 = vadd.f32 %v1590_v52, %v486_v5  ;;  %v796_v5 = vld [vmem:[#allocation2] sm:$0x1] }
 0x1dd   :  { %v1112_v8 = vpop.f32.mrf.mxu1 }
 0x1de   :  { %v539_v9 = vmax.f32 %v487_v7, 0.0 }
 0x1df   :  { %v491_v11 = vpop.f32.mrf.mxu1 }
 0x1e0   :  { %v556_v12 = vpack.c.bf16 %v539_v9, %v538_v6  ;;  %v492_v13 = vadd.f32 %v1590_v52, %v491_v11  ;;  %v1249_v6 = vmov 0  }
 0x1e1   :  { %v1115_v14 = vpop.f32.mrf.mxu1  ;;  %1206 = vset.pattern.permute.xlu0 %v1249_v6 }
 0x1e2   :  { %1178 = vmatmul.mubr.bf16.gmra.mxu0 %v556_v12  ;;  %v540_v17 = vmax.f32 %v492_v13, 0.0  ;;  %799 = vperm.xlu0 %1206, %v796_v5  }
 0x1e3   :  { %v494_v15 = vpop.f32.mrf.mxu1  ;;  %1181 = vmatprep.mubr.msk.bf16.mxu0 %vm1248_vm0, %v1247_v2 }
 0x1e4   :  { %v495_v18 = vadd.f32 %v1590_v52, %v494_v15 }
 0x1e5   :  { %v1116_v19 = vpop.f32.mrf.mxu1 }
 0x1e6   :  { %v541_v20 = vmax.f32 %v495_v18, 0.0  ;;  %v1661_v18 = vld [vmem:[%s1752_s6] ss:$0 sm:$0xff] }
 0x1e7   :  { %v499_v21 = vpop.f32.mrf.mxu1 }
 0x1e8   :  { %v557_v22 = vpack.c.bf16 %v541_v20, %v540_v17  ;;  %v500_v24 = vadd.f32 %v1590_v52, %v499_v21 }
 0x1e9   :  { %v1119_v25 = vpop.f32.mrf.mxu1 }
 0x1ea   :  { %1182 = vmatmul.mubr.bf16.gmra.mxu0 %v557_v22  ;;  %v542_v27 = vmax.f32 %v500_v24, 0.0 }
 0x1eb   :  { %v502_v26 = vpop.f32.mrf.mxu1  ;;  %1185 = vmatprep.mubr.msk.bf16.mxu0 %vm1248_vm0, %v1247_v2 }
 0x1ec   :  { %v503_v28 = vadd.f32 %v1590_v52, %v502_v26 }
 0x1ed   :  { %v1120_v30 = vpop.f32.mrf.mxu1 }
 0x1ee   :  { %v543_v31 = vmax.f32 %v503_v28, 0.0 }
 0x1ef   :  { %v507_v32 = vpop.f32.mrf.mxu1 }
 0x1f0   :  { %v558_v33 = vpack.c.bf16 %v543_v31, %v542_v27  ;;  %v508_v34 = vadd.f32 %v1590_v52, %v507_v32 }
 0x1f1   :  { %v1123_v59 = vpop.f32.mrf.mxu1 }
 0x1f2   :  { %1186 = vmatmul.mubr.bf16.gmra.mxu0 %v558_v33  ;;  %v544_v35 = vmax.f32 %v508_v34, 0.0 }
 0x1f3   :  { %v510_v3 = vpop.f32.mrf.mxu1  ;;  %1189 = vmatprep.mubr.msk.bf16.mxu0 %vm1248_vm0, %v1247_v2 }
 0x1f4   :  { %v511_v37 = vadd.f32 %v1590_v52, %v510_v3 }
 0x1f5   :  { %v1124_v38 = vpop.f32.mrf.mxu1 }
 0x1f6   :  { %v545_v10 = vmax.f32 %v511_v37, 0.0 }
 0x1f7   :  { %v515_v16 = vpop.f32.mrf.mxu1 }
 0x1f8   :  { %v559_v39 = vpack.c.bf16 %v545_v10, %v544_v35  ;;  %v516_v40 = vadd.f32 %v1590_v52, %v515_v16 }
 0x1f9   :  { %v1127_v23 = vpop.f32.mrf.mxu1 }
 0x1fa   :  { %1190 = vmatmul.mubr.bf16.gmra.mxu0 %v559_v39  ;;  %v546_v29 = vmax.f32 %v516_v40, 0.0 }
 0x1fb   :  { %v518_v41 = vpop.f32.mrf.mxu1  ;;  %1193 = vmatprep.mubr.msk.bf16.mxu0 %vm1248_vm0, %v1247_v2 }
 0x1fc   :  { %v519_v43 = vadd.f32 %v1590_v52, %v518_v41 }
 0x1fd   :  { %v1128_v44 = vpop.f32.mrf.mxu1 }
 0x1fe   :  { %v547_v36 = vmax.f32 %v519_v43, 0.0 }
 0x200   :  { %v560_v45 = vpack.c.bf16 %v547_v36, %v546_v29 }
 0x202   :  { %1194 = vmatmul.mubr.bf16.gmra.mxu0 %v560_v45 }
 0x262   :  { %v1642_v42 = vpop.f32.mrf.mxu0 }
 0x264   :  { %v1147_v46 = vpop.f32.mrf.mxu0 }
 0x266   :  { %v1644_v47 = vpop.f32.mrf.mxu0 }
 0x268   :  { %v1148_v48 = vpop.f32.mrf.mxu0 }
 0x26a   :  { %v1646_v50 = vpop.f32.mrf.mxu0 }
 0x26c   :  { %v1151_v51 = vpop.f32.mrf.mxu0 }
 0x26e   :  { %v1648_v49 = vpop.f32.mrf.mxu0 }
 0x270   :  { %v1152_v53 = vpop.f32.mrf.mxu0 }
 0x272   :  { %v1650_v54 = vpop.f32.mrf.mxu0 }
 0x274   :  { %v1155_v55 = vpop.f32.mrf.mxu0 }
 0x276   :  { %v1652_v52 = vpop.f32.mrf.mxu0 }
 0x278   :  { %v1156_v57 = vpop.f32.mrf.mxu0 }
 0x27a   :  { %v1654_v56 = vpop.f32.mrf.mxu0 }
 0x27b   :  { %v691_v57 = vadd.f32 %v1661_v18, %v1654_v56  ;;  %v678_v56 = vadd.f32 %v1661_v18, %v1648_v49  ;;  %v667_v49 = vadd.f32 %v1661_v18, %v1642_v42 }
 0x27c   :  { %v1159_v58 = vpop.f32.mrf.mxu0 }
 0x27e   :  { %v1656_v60 = vpop.f32.mrf.mxu0 }
 0x27f   :  { %v694_v48 = vadd.f32 %v1661_v18, %v1656_v60 }
 0x280   :  { %v1160_v61 = vpop.f32.mrf.mxu0 }
 0x281   :  { %v776_v58 = vmax.f32 %v694_v48, 0.0 }
 0x282   :  { %v698_v62 = vpop.f32.mrf.mxu0 }
 0x283   :  { %v699_v44 = vadd.f32 %v1661_v18, %v698_v62 }
 0x284   :  { %v1163_v63 = vpop.f32.mrf.mxu0 }
 0x285   :  { %v777_v51 = vmax.f32 %v699_v44, 0.0  ;;  %v686_v63 = vadd.f32 %v1661_v18, %v1652_v52  ;;  %v675_v52 = vadd.f32 %v1661_v18, %v1646_v50 }
 0x286   :  { %v701_v0 = vpop.f32.mrf.mxu0 }
 0x287   :  { %v702_v23 = vadd.f32 %v1661_v18, %v701_v0  ;;  %v775_v0 = vmax.f32 %v691_v57, 0.0  ;;  %v774_v5 = vmax.f32 %v686_v63, 0.0 }
 0x288   :  { %v1164_v1 = vpop.f32.mrf.mxu0 }
 0x289   :  { %v778_v36 = vmax.f32 %v702_v23, 0.0 }
 0x28a   :  { %v706_v4 = vpop.f32.mrf.mxu0 }
 0x28b   :  { %v707_v10 = vadd.f32 %v1661_v18, %v706_v4  ;;  %v683_v4 = vadd.f32 %v1661_v18, %v1650_v54  ;;  %v670_v54 = vadd.f32 %v1661_v18, %v1644_v47 }
 0x28c   :  { %v1167_v7 = vpop.f32.mrf.mxu0 }
 0x28d   :  { %v779_v41 = vmax.f32 %v707_v10, 0.0  ;;  %v773_v6 = vmax.f32 %v683_v4, 0.0  ;;  %v772_v7 = vmax.f32 %v678_v56, 0.0  ;;  %v800_v10 = vpop.permute.xlu0 %799 }
 0x28e   :  { %v709_v8 = vpop.f32.mrf.mxu0 }
 0x28f   :  { %v710_v3 = vadd.f32 %v1661_v18, %v709_v8  ;;  %v771_v8 = vmax.f32 %v675_v52, 0.0 }
 0x290   :  { %v1168_v9 = vpop.f32.mrf.mxu0 }
 0x291   :  { %v780_v16 = vmax.f32 %v710_v3, 0.0  ;;  %v770_v9 = vmax.f32 %v670_v54, 0.0  ;;  %v802_v3 = vlaneseq }
 0x292   :  { %v714_v11 = vpop.f32.mrf.mxu0 }
 0x293   :  { %v715_v32 = vadd.f32 %v1661_v18, %v714_v11  ;;  %v769_v11 = vmax.f32 %v667_v49, 0.0  ;;  %vm897_vm2 = vcmp.lt.s32.totalorder %v802_v3, 208 }
 0x294   :  { %v1171_v12 = vpop.f32.mrf.mxu0 }
 0x295   :  { %v781_v35 = vmax.f32 %v715_v32, 0.0 }
 0x296   :  { %v717_v13 = vpop.f32.mrf.mxu0 }
 0x297   :  { %v718_v27 = vadd.f32 %v1661_v18, %v717_v13 }
 0x298   :  { %v1172_v14 = vpop.f32.mrf.mxu0 }
 0x299   :  { %v782_v33 = vmax.f32 %v718_v27, 0.0 }
 0x29a   :  { %v722_v15 = vpop.f32.mrf.mxu0 }
 0x29b   :  { %v723_v22 = vadd.f32 %v1661_v18, %v722_v15 }
 0x29c   :  { %v1175_v17 = vpop.f32.mrf.mxu0 }
 0x29d   :  { %v783_v28 = vmax.f32 %v723_v22, 0.0 }
 0x29e   :  { %v725_v19 = vpop.f32.mrf.mxu0 }
 0x29f   :  { %v726_v20 = vadd.f32 %v1661_v18, %v725_v19 }
 0x2a0   :  { %v1176_v21 = vpop.f32.mrf.mxu0 }
 0x2a1   :  { %v784_v24 = vmax.f32 %v726_v20, 0.0 }
 0x2a2   :  { %v1665_v25 = vpop.f32.mrf.mxu0 }
 0x2a3   :  { %807 = vmatpush1.xpose.msra.mxu1 %v784_v24  ;;  %v731_v32 = vadd.f32 %v1661_v18, %v1665_v25 }
 0x2a4   :  { %808 = vmatprep.subr.mxu1 %v1247_v2  ;;  %v1179_v26 = vpop.f32.mrf.mxu0 }
 0x2a6   :  { %v1669_v30 = vpop.f32.mrf.mxu0 }
 0x2a7   :  { %809 = vmatpush1.xpose.msra.mxu1 %v783_v28  ;;  %v734_v28 = vadd.f32 %v1661_v18, %v1669_v30  ;;  %v803_v30 = vshrl.u32 %v802_v3, 7 }
 0x2a8   :  { %810 = vmatprep.subr.mxu1 %v1247_v2  ;;  %v1180_v31 = vpop.f32.mrf.mxu0 }
 0x2aa   :  { %v1673_v34 = vpop.f32.mrf.mxu0 }
 0x2ab   :  { %811 = vmatpush1.xpose.msra.mxu1 %v782_v33  ;;  %v739_v26 = vadd.f32 %v1661_v18, %v1673_v34  ;;  %v786_v33 = vmax.f32 %v734_v28, 0.0  ;;  %v795_v34 = vld [vmem:[%s1753_s7] sm:$0x1]  ;;  %s1225_s7 = scalar_lea.vmem %s907_s10, 32 }
 0x2ac   :  { %812 = vmatprep.subr.mxu1 %v1247_v2  ;;  %v1183_v59 = vpop.f32.mrf.mxu0  ;;  %p1226_p0 = scmp.ne.s32.totalorder %s907_s10, %s1225_s7  ;;  %p1231_p2 = scmp.lt.s32.totalorder %s1225_s7, %s1225_s7 }
 0x2ad   :  { %v787_v31 = vmax.f32 %v739_v26, 0.0  ;;  %v785_v59 = vmax.f32 %v731_v32, 0.0 }
 0x2ae   :  { %v1677_v37 = vpop.f32.mrf.mxu0  ;;  %p1232_p3 = por %p1231_p2, %p1230_p1 }
 0x2af   :  { %813 = vmatpush1.xpose.msra.mxu1 %v781_v35  ;;  %v742_v22 = vadd.f32 %v1661_v18, %v1677_v37  ;;  %v804_v35 = vsub.s32 0, %v803_v30  ;;  %v1250_v37 = vmov 1966171168  }
 0x2b0   :  { %814 = vmatprep.subr.mxu1 %v1247_v2  ;;  %v1184_v38 = vpop.f32.mrf.mxu0  ;;  %p1233_p4 = pnand %p1232_p3, %p1226_p0 }
 0x2b1   :  { %v788_v27 = vmax.f32 %v742_v22, 0.0  ;;  %v881_v38 = vunpack.c.l.s4 %v1250_v37 }
 0x2b2   :  { %v1681_v39 = vpop.f32.mrf.mxu0 }
 0x2b3   :  { %815 = vmatpush1.xpose.msra.mxu1 %v780_v16  ;;  %v747_v20 = vadd.f32 %v1661_v18, %v1681_v39  ;;  %v805_v16 = vrot.slane %v800_v10, %v804_v35  ;;  %v882_v39 = vunpack.c.0.s8 %v881_v38 }
 0x2b4   :  { %816 = vmatprep.subr.mxu1 %v1247_v2  ;;  %v1187_v40 = vpop.f32.mrf.mxu0 }
 0x2b5   :  { %v789_v24 = vmax.f32 %v747_v20, 0.0 }
 0x2b6   :  { %v1685_v29 = vpop.f32.mrf.mxu0 }
 0x2b7   :  { %817 = vmatpush1.xpose.msra.mxu1 %v779_v41  ;;  %v750_v17 = vadd.f32 %v1661_v18, %v1685_v29 }
 0x2b8   :  { %818 = vmatprep.subr.mxu1 %v1247_v2  ;;  %v1188_v43 = vpop.f32.mrf.mxu0 }
 0x2b9   :  { %v790_v21 = vmax.f32 %v750_v17, 0.0 }
 0x2ba   :  { %v754_v45 = vpop.f32.mrf.mxu0 }
 0x2bb   :  { %819 = vmatpush1.xpose.msra.mxu1 %v778_v36  ;;  %v755_v42 = vadd.f32 %v1661_v18, %v754_v45 }
 0x2bc   :  { %820 = vmatprep.subr.mxu1 %v1247_v2  ;;  %v1191_v46 = vpop.f32.mrf.mxu0 }
 0x2bd   :  { %v791_v19 = vmax.f32 %v755_v42, 0.0 }
 0x2be   :  { %v757_v53 = vpop.f32.mrf.mxu0 }
 0x2bf   :  { %821 = vmatpush1.xpose.msra.mxu1 %v777_v51  ;;  %v758_v13 = vadd.f32 %v1661_v18, %v757_v53 }
 0x2c0   :  { %822 = vmatprep.subr.mxu1 %v1247_v2  ;;  %v1192_v55 = vpop.f32.mrf.mxu0 }
 0x2c1   :  { %v792_v15 = vmax.f32 %v758_v13, 0.0 }
 0x2c2   :  { %v762_v61 = vpop.f32.mrf.mxu0 }
 0x2c3   :  { %823 = vmatpush1.xpose.msra.mxu1 %v776_v58  ;;  %v763_v12 = vadd.f32 %v1661_v18, %v762_v61 }
 0x2c4   :  { %824 = vmatprep.subr.mxu1 %v1247_v2  ;;  %v1195_v62 = vpop.f32.mrf.mxu0 }
 0x2c5   :  { %v793_v14 = vmax.f32 %v763_v12, 0.0 }
 0x2c6   :  { %v765_v60 = vpop.f32.mrf.mxu0 }
 0x2c7   :  { %825 = vmatpush1.xpose.msra.mxu1 %v775_v0  ;;  %v766_v50 = vadd.f32 %v1661_v18, %v765_v60 }
 0x2c8   :  { %826 = vmatprep.subr.mxu1 %v1247_v2  ;;  %v1196_v1 = vpop.f32.mrf.mxu0 }
 0x2c9   :  { %v794_v47 = vmax.f32 %v766_v50, 0.0 }
 0x2cb   :  { %827 = vmatpush1.xpose.msra.mxu1 %v774_v5 }
 0x2cc   :  { %828 = vmatprep.subr.mxu1 %v1247_v2 }
 0x2cf   :  { %829 = vmatpush1.xpose.msra.mxu1 %v773_v6 }
 0x2d0   :  { %830 = vmatprep.subr.mxu1 %v1247_v2 }
 0x2d3   :  { %831 = vmatpush1.xpose.msra.mxu1 %v772_v7 }
 0x2d4   :  { %832 = vmatprep.subr.mxu1 %v1247_v2 }
 0x2d7   :  { %833 = vmatpush1.xpose.msra.mxu1 %v771_v8 }
 0x2d8   :  { %834 = vmatprep.subr.mxu1 %v1247_v2 }
 0x2db   :  { %835 = vmatpush1.xpose.msra.mxu1 %v770_v9 }
 0x2dc   :  { %836 = vmatprep.subr.mxu1 %v1247_v2 }
 0x2df   :  { %837 = vmatpush1.xpose.msra.mxu1 %v769_v11 }
 0x2e0   :  { %850 = vmatprep.subr.mxu1 %v1247_v2 }
 0x2e3   :  { %851 = vmatpush2.xpose.msra.mxu1 %v794_v47 }
 0x2e4   :  { %852 = vmatprep.subr.mxu1 %v1247_v2 }
 0x2e7   :  { %853 = vmatpush2.xpose.msra.mxu1 %v793_v14 }
 0x2e8   :  { %854 = vmatprep.subr.mxu1 %v1247_v2 }
 0x2eb   :  { %855 = vmatpush2.xpose.msra.mxu1 %v792_v15 }
 0x2ec   :  { %856 = vmatprep.subr.mxu1 %v1247_v2 }
 0x2ef   :  { %857 = vmatpush2.xpose.msra.mxu1 %v791_v19 }
 0x2f0   :  { %858 = vmatprep.subr.mxu1 %v1247_v2 }
 0x2f3   :  { %859 = vmatpush2.xpose.msra.mxu1 %v790_v21 }
 0x2f4   :  { %860 = vmatprep.subr.mxu1 %v1247_v2 }
 0x2f7   :  { %861 = vmatpush2.xpose.msra.mxu1 %v789_v24 }
 0x2f8   :  { %862 = vmatprep.subr.mxu1 %v1247_v2 }
 0x2fb   :  { %863 = vmatpush2.xpose.msra.mxu1 %v788_v27 }
 0x2fc   :  { %864 = vmatprep.subr.mxu1 %v1247_v2 }
 0x2ff   :  { %865 = vmatpush2.xpose.msra.mxu1 %v787_v31 }
 0x300   :  { %866 = vmatprep.subr.mxu1 %v1247_v2 }
 0x303   :  { %867 = vmatpush2.xpose.msra.mxu1 %v786_v33 }
 0x304   :  { %868 = vmatprep.subr.mxu1 %v1247_v2  ;;  %v885_v2 = vsub.s32 %v882_v39, %v803_v30 }
 0x307   :  { %869 = vmatpush2.xpose.msra.mxu1 %v785_v59 }
 0x30a   :  { %871 = vmatmul.mubr.f32.vlgmr.msra.gmra.mxu1 %v795_v34 }
 0x3ca   :  { %v872_v18 = vpop.f32.mrf.mxu1 }
 0x3cb   :  { %v873_v40 = vadd.f32 %v872_v18, %v805_v16 }
 0x3cc   :  { %v874_v25 = vpop.f32.mrf.mxu1 }
 0x3cd   :  { %v875_v23 = vadd.f32 %v874_v25, %v805_v16 }
 0x3cf   :  { %v879_v41 = vcombine.low %v873_v40, %v875_v23 }
 0x3d1   :  { %v886_v29 = vrot.slane %v879_v41, %v885_v2 }
 0x3d3   :  { %v893_v43 = vrot.slane %v886_v29, %v885_v2 }
 0x3d5   :  { %899 = vst.msk [vmem:[#allocation3] sm:$0x3] %vm897_vm2, %v893_v43 }
 0x3d6   :  { %1236 = shalt.err (!%p1233_p4)
}
 0x3d7   :  { %909 = dma.vmem_to_hbm [thread:$0]  %s907_s10, 32, %s1755_s9, [#allocation4]  }
 0x3d8   :  { %1245 = dma.done.wait [#allocation4], 32  }
 0x3d9   :  { %1246 = vsyncadd [#allocation4], 4294967264 }
 0x3da   :  { %913 = vsyncpa [#allocation4], 1 }

</bundles_post_ra>
